<compile_context>
chip_gen: v6e
topology: v6e:2x2x1
jax: 0.10.0
libtpu: 0.0.40
codegen_flags: <defaults>
</compile_context>

<pallas_src>
import functools

import jax
import jax.numpy as jnp
from jax.experimental import pallas as pl
from jax.experimental.pallas import tpu as pltpu


def _round_up(x, m):
    return ((x + m - 1) // m) * m


def _gat_kernel(adj_ref, esrc_ref, edst_ref, wh_ref, out_ref, *, alpha):
    # Attention logits for this row block: e[i,j] = LeakyReLU(e_src[i] + e_dst[j]).
    s = esrc_ref[...] + edst_ref[...]                          # (TM, Np) f32
    if alpha <= 1.0:                                           # GAT default alpha=0.2
        s = jnp.maximum(s, alpha * s)                          # LeakyReLU: 1 max + 1 mul
    else:
        s = jnp.where(s > 0, s, alpha * s)

    # Adjacency as an additive bias: 0 (edge), -9e15 (no edge), -inf (padded col).
    s = s + adj_ref[...].astype(jnp.float32)

    # Row softmax with deferred normalization (the rescale commutes with the matmul,
    # so the (TM, Np) divide and the materialized attention matrix are avoided).
    m = jnp.max(s, axis=1, keepdims=True)                      # (TM, 1)
    p = jnp.exp(s - m)                                         # (TM, Np)
    row_sum = jnp.sum(p, axis=1, keepdims=True)                # (TM, 1)

    # Dominant MXU term: bf16 operands, f32 accumulation.
    out = jnp.dot(p.astype(jnp.bfloat16), wh_ref[...],
                  preferred_element_type=jnp.float32)          # (TM, Fp)

    inv = pl.reciprocal(row_sum, approx=True)                  # EUP slot (free-ish)
    inv = inv * (2.0 - row_sum * inv)                          # one Newton refinement
    out = out * inv

    # ELU (concat=True).  exp(x)-1 is within ~1e-8 of expm1 at f32 scale.
    out_ref[...] = jnp.where(out > 0, out, jnp.exp(out) - 1.0)


def graph_attention_layer(adj, h, w, b, a_w, a_b, *, alpha=0.2, block_rows=None):
    """adj: (N, N), h: (N, F_in).  Weights in PyTorch layout:
    w: (F_out, F_in), b: (F_out,), a_w: (1, 2*F_out), a_b: (1,)."""
    n, f_in = h.shape
    f_out = w.shape[0]
    f32 = jnp.float32
    bf16 = jnp.bfloat16

    LANE = 128      # lane width -> lane-dense feature axis / output stores
    SUB = 16        # sublane multiple (bf16 adjacency tiles pack 16 sublanes)

    f_pad = _round_up(max(f_out, LANE), LANE)

    # ---- generation-aware VMEM budget & row-block size ----------------------
    try:
        vmem_phys = int(pltpu.get_tpu_info().vmem_capacity_bytes)
    except Exception:
        vmem_phys = 64 * 1024 * 1024            # conservative (v7x-sized) fallback
    vmem_limit = int(min((vmem_phys * 3) // 4, 100 * 1024 * 1024))

    if block_rows is None:
        n_guess = _round_up(n, SUB)
        resident = n_guess * f_pad * 2 + n_guess * 4 + (4 << 20)   # wh + e_dst + slack
        per_row = n_guess * 24 + f_pad * 8 + 64    # adj strip (x2 bf16) + f32/bf16 temps + out
        budget = max(vmem_limit - resident, 1 << 20)
        cap = 256 if vmem_phys <= (64 << 20) else 512
        block_rows = int(min(max((budget // per_row) // SUB * SUB, SUB), cap))

    if n <= block_rows:
        # Split small graphs into two row blocks so both v7x TensorCores get work
        # under "parallel" grid semantics (no effect on 1-TC v5e/v6e beyond ~0.35us).
        tm = _round_up(-(-n // 2), SUB) if n >= 4 * SUB else _round_up(n, SUB)
    else:
        tm = _round_up(block_rows, SUB)
    n_pad = _round_up(n, tm)
    grid = n_pad // tm

    # ---- hoisted grid-invariant compute (plain XLA, once) -------------------
    w = jnp.asarray(w, f32)
    b2 = jnp.asarray(b, f32).reshape(1, f_out)
    a_w = jnp.asarray(a_w, f32)
    a1 = a_w[:, :f_out]                                         # (1, F_out)
    a2 = a_w[:, f_out:]                                         # (1, F_out)
    ab = jnp.asarray(a_b, f32).reshape(())
    h = jnp.asarray(h, f32)

    wh = h @ w.T + b2                                           # (N, F_out) f32
    e_src = wh @ a1.T + ab                                      # (N, 1)
    e_dst = (wh @ a2.T).T                                       # (1, N)

    wh_p = jnp.zeros((n_pad, f_pad), bf16).at[:n, :f_out].set(wh.astype(bf16))
    e_src_p = jnp.zeros((n_pad, 1), f32).at[:n, :].set(e_src)
    e_dst_p = jnp.zeros((1, n_pad), f32).at[:, :n].set(e_dst)

    # Adjacency as a bf16 additive-bias plane: 0 (edge), -9e15 (masked), -inf
    # (padded column -> exp weight exactly 0, so padded rows of wh never leak in).
    neg = jnp.float32(-9000000000000000.0)
    adj_bias = jnp.where(jnp.asarray(adj) > 0, jnp.float32(0.0), neg)
    adj_p = jnp.full((n_pad, n_pad), neg, f32)
    adj_p = adj_p.at[:, n:].set(-jnp.inf)
    adj_p = adj_p.at[:n, :n].set(adj_bias)
    adj_p = adj_p.astype(bf16)

    cost = pl.CostEstimate(
        flops=int(2 * n_pad * n_pad * f_pad          # p @ wh
                  + 6 * n_pad * n_pad),              # score / mask / softmax elementwise
        transcendentals=int(n_pad * n_pad + n_pad * f_pad),
        bytes_accessed=int(n_pad * n_pad * 2         # adj bias strip (bf16)
                           + n_pad * f_pad * 2       # wh (bf16)
                           + n_pad * f_pad * 4       # output
                           + 2 * n_pad * 4),         # e_src / e_dst
    )

    def _call(single_buffer_resident):
        def resident(shape):
            # Constant-index_map inputs are fetched once; single-buffer them to
            # free VMEM headroom (matters most on v7x's 64 MiB).
            if single_buffer_resident:
                return pl.BlockSpec(shape, lambda i: (0, 0),
                                    pipeline_mode=pl.Buffered(1))
            return pl.BlockSpec(shape, lambda i: (0, 0))

        return pl.pallas_call(
            functools.partial(_gat_kernel, alpha=float(alpha)),
            out_shape=jax.ShapeDtypeStruct((n_pad, f_pad), f32),
            grid_spec=pltpu.PrefetchScalarGridSpec(
                num_scalar_prefetch=0,
                grid=(grid,),
                in_specs=[
                    pl.BlockSpec((tm, n_pad), lambda i: (i, 0)),   # adj bias strip (bf16)
                    pl.BlockSpec((tm, 1), lambda i: (i, 0)),       # e_src column block
                    resident((1, n_pad)),                          # e_dst row (whole)
                    resident((n_pad, f_pad)),                      # wh values (whole, bf16)
                ],
                out_specs=pl.BlockSpec((tm, f_pad), lambda i: (i, 0)),
            ),
            compiler_params=pltpu.CompilerParams(
                dimension_semantics=("parallel",),   # stateless grid -> megacore shard
                vmem_limit_bytes=vmem_limit,
            ),
            cost_estimate=cost,
        )(adj_p, e_src_p, e_dst_p, wh_p)

    try:
        out_padded = _call(True)
    except Exception:
        # pipeline_mode / Buffered(1) unavailable -> default double buffering.
        out_padded = _call(False)

    return out_padded[:n, :f_out]


def _reference(adj, h, w, b, a_w, a_b, alpha):
    """Pure-JAX reference mirroring the PyTorch forward (eval mode)."""
    wh = h @ w.T + b                                        # (N, F_out)
    n, f_out = wh.shape
    rep_chunks = jnp.repeat(wh, n, axis=0)                  # repeat_interleave
    rep_alt = jnp.tile(wh, (n, 1))                          # repeat(N, 1)
    a_input = jnp.concatenate([rep_chunks, rep_alt], axis=1).reshape(n, n, 2 * f_out)
    a_out = (a_input @ a_w.T + a_b)[..., 0]                 # (N, N)
    lrelu = jnp.where(a_out > 0, a_out, alpha * a_out)
    masked = jnp.where(adj > 0, lrelu, -9000000000000000.0 * jnp.ones_like(lrelu))
    attn = jax.nn.softmax(masked, axis=1)
    out = attn @ wh
    return jnp.where(out > 0, out, jnp.exp(out) - 1.0)


if __name__ == "__main__":
    key = jax.random.PRNGKey(0)

    def run_case(case_key, n, f_in, f_out, alpha):
        k_adj, k_h, k_w, k_b, k_aw, k_ab = jax.random.split(case_key, 6)
        adj = (jax.random.uniform(k_adj, (n, n)) > 0.5).astype(jnp.float32)
        adj = jnp.maximum(adj, jnp.eye(n, dtype=jnp.float32))   # self-loops
        h = jax.random.normal(k_h, (n, f_in), dtype=jnp.float32)
        w = jax.random.normal(k_w, (f_out, f_in), dtype=jnp.float32) * 0.2
        b = jax.random.normal(k_b, (f_out,), dtype=jnp.float32) * 0.1
        a_w = jax.random.normal(k_aw, (1, 2 * f_out), dtype=jnp.float32) * 0.2
        a_b = jax.random.normal(k_ab, (1,), dtype=jnp.float32) * 0.1

        out = jax.block_until_ready(
            graph_attention_layer(adj, h, w, b, a_w, a_b, alpha=alpha))
        ref = _reference(adj, h, w, b, a_w, a_b, alpha)
        assert out.shape == (n, f_out)
        # Tolerance relaxed vs v1: the aggregation matmul runs with bf16 operands
        # (f32 accumulation) per the perf review.
        assert jnp.allclose(out, ref, atol=1e-2, rtol=1e-2), (
            f"mismatch vs reference (n={n}), "
            f"max abs err {float(jnp.max(jnp.abs(out - ref)))}")

    k1, k2 = jax.random.split(key)
    run_case(k1, 8, 16, 32, 0.2)     # tiny graph, grid=1, heavy padding path
    run_case(k2, 300, 16, 32, 0.2)   # split into 2 row blocks (grid=2) + padding

    print("KERNEL_OK")
</pallas_src>

<mosaic_0001>
module attributes {stable_mosaic.version = 11 : i64} {
  func.func @_gat_kernel(%arg0: i32, %arg1: memref<16x16xbf16, #tpu.memory_space<vmem>>, %arg2: memref<16x1xf32, #tpu.memory_space<vmem>>, %arg3: memref<1x16xf32, #tpu.memory_space<vmem>>, %arg4: memref<16x128xbf16, #tpu.memory_space<vmem>>, %arg5: memref<16x128xf32, #tpu.memory_space<vmem>>) attributes {dimension_semantics = [#tpu.dimension_semantics<parallel>], iteration_bounds = array<i64: 1>, scalar_prefetch = 0 : i64, scratch_operands = 0 : i64, tpu.core_type = #tpu.core_type<tc>, window_params = [{transform_indices = @transform_0, window_bounds = array<i64: 16, 16>}, {transform_indices = @transform_1, window_bounds = array<i64: 16, 1>}, {pipeline_mode = #tpu.pipeline_mode<synchronous>, transform_indices = @transform_2, window_bounds = array<i64: 1, 16>}, {pipeline_mode = #tpu.pipeline_mode<synchronous>, transform_indices = @transform_3, window_bounds = array<i64: 16, 128>}, {transform_indices = @transform_4, window_bounds = array<i64: 16, 128>}]} {
    %c0 = arith.constant 0 : index
    %c0_0 = arith.constant 0 : index
    %0 = vector.load %arg2[%c0, %c0_0] : memref<16x1xf32, #tpu.memory_space<vmem>>, vector<16x1xf32>
    %c0_1 = arith.constant 0 : index
    %c0_2 = arith.constant 0 : index
    %1 = vector.load %arg3[%c0_1, %c0_2] : memref<1x16xf32, #tpu.memory_space<vmem>>, vector<1x16xf32>
    %2 = vector.broadcast %0 : vector<16x1xf32> to vector<16x16xf32>
    %3 = vector.broadcast %1 : vector<1x16xf32> to vector<16x16xf32>
    %4 = arith.addf %2, %3 : vector<16x16xf32>
    %cst = arith.constant 2.000000e-01 : f32
    %5 = vector.broadcast %cst : f32 to vector<16x16xf32>
    %6 = arith.mulf %5, %4 : vector<16x16xf32>
    %7 = arith.maximumf %4, %6 : vector<16x16xf32>
    %c0_3 = arith.constant 0 : index
    %c0_4 = arith.constant 0 : index
    %8 = vector.load %arg1[%c0_3, %c0_4] : memref<16x16xbf16, #tpu.memory_space<vmem>>, vector<16x16xbf16>
    %9 = arith.extf %8 : vector<16x16xbf16> to vector<16x16xf32>
    %10 = arith.addf %7, %9 : vector<16x16xf32>
    %cst_5 = arith.constant dense<0xFF800000> : vector<16xf32>
    %11 = vector.multi_reduction <maximumf>, %10, %cst_5 [1] : vector<16x16xf32> to vector<16xf32>
    %12 = vector.shape_cast %11 : vector<16xf32> to vector<16x1xf32>
    %13 = vector.broadcast %12 : vector<16x1xf32> to vector<16x16xf32>
    %14 = arith.subf %10, %13 : vector<16x16xf32>
    %15 = math.exp %14 : vector<16x16xf32>
    %cst_6 = arith.constant dense<0.000000e+00> : vector<16xf32>
    %16 = vector.multi_reduction <add>, %15, %cst_6 [1] : vector<16x16xf32> to vector<16xf32>
    %17 = vector.shape_cast %16 : vector<16xf32> to vector<16x1xf32>
    %18 = arith.truncf %15 : vector<16x16xf32> to vector<16x16xbf16>
    %c0_7 = arith.constant 0 : index
    %c0_8 = arith.constant 0 : index
    %19 = vector.load %arg4[%c0_7, %c0_8] : memref<16x128xbf16, #tpu.memory_space<vmem>>, vector<16x128xbf16>
    %cst_9 = arith.constant dense<0.000000e+00> : vector<16x128xf32>
    %20 = tpu.matmul %18, %19, %cst_9 {dimension_numbers = #tpu.dot_dimension_numbers<[1], [0], [0], [1], [0, 0, 1, 1], [], []>} : vector<16x16xbf16>, vector<16x128xbf16>, vector<16x128xf32> -> vector<16x128xf32>
    %21 = tpu.reciprocal %17 {approx = true} : vector<16x1xf32> -> vector<16x1xf32>
    %22 = arith.mulf %17, %21 : vector<16x1xf32>
    %cst_10 = arith.constant 2.000000e+00 : f32
    %23 = vector.broadcast %cst_10 : f32 to vector<16x1xf32>
    %24 = arith.subf %23, %22 : vector<16x1xf32>
    %25 = arith.mulf %21, %24 : vector<16x1xf32>
    %26 = vector.broadcast %25 : vector<16x1xf32> to vector<16x128xf32>
    %27 = arith.mulf %20, %26 : vector<16x128xf32>
    %cst_11 = arith.constant 0.000000e+00 : f32
    %28 = vector.broadcast %cst_11 : f32 to vector<16x128xf32>
    %29 = arith.cmpf ogt, %27, %28 : vector<16x128xf32>
    %30 = math.exp %27 : vector<16x128xf32>
    %cst_12 = arith.constant 1.000000e+00 : f32
    %31 = vector.broadcast %cst_12 : f32 to vector<16x128xf32>
    %32 = arith.subf %30, %31 : vector<16x128xf32>
    %33 = arith.select %29, %27, %32 : vector<16x128xi1>, vector<16x128xf32>
    %c0_13 = arith.constant 0 : index
    %c0_14 = arith.constant 0 : index
    %34 = vector.load %arg5[%c0_13, %c0_14] : memref<16x128xf32, #tpu.memory_space<vmem>>, vector<16x128xf32>
    tpu.vector_store %arg5[%c0_13, %c0_14], %33 {strides = array<i32>} : memref<16x128xf32, #tpu.memory_space<vmem>>, vector<16x128xf32>,
    return
  }
  func.func @transform_0(%arg0: i32) -> (i32, i32) {
    %c0_i32 = arith.constant 0 : i32
    %c0_i32_0 = arith.constant 0 : i32
    return %arg0, %c0_i32 : i32, i32
  }
  func.func @transform_1(%arg0: i32) -> (i32, i32) {
    %c0_i32 = arith.constant 0 : i32
    %c0_i32_0 = arith.constant 0 : i32
    return %arg0, %c0_i32 : i32, i32
  }
  func.func @transform_2(%arg0: i32) -> (i32, i32) {
    %c0_i32 = arith.constant 0 : i32
    %c0_i32_0 = arith.constant 0 : i32
    %c0_i32_1 = arith.constant 0 : i32
    return %c0_i32, %c0_i32_0 : i32, i32
  }
  func.func @transform_3(%arg0: i32) -> (i32, i32) {
    %c0_i32 = arith.constant 0 : i32
    %c0_i32_0 = arith.constant 0 : i32
    %c0_i32_1 = arith.constant 0 : i32
    return %c0_i32, %c0_i32_0 : i32, i32
  }
  func.func @transform_4(%arg0: i32) -> (i32, i32) {
    %c0_i32 = arith.constant 0 : i32
    %c0_i32_0 = arith.constant 0 : i32
    return %arg0, %c0_i32 : i32, i32
  }
}

module attributes {stable_mosaic.version = 11 : i64} {
  func.func @_gat_kernel(%arg0: i32, %arg1: memref<16x16xbf16, #tpu.memory_space<vmem>>, %arg2: memref<16x1xf32, #tpu.memory_space<vmem>>, %arg3: memref<1x16xf32, #tpu.memory_space<vmem>>, %arg4: memref<16x128xbf16, #tpu.memory_space<vmem>>, %arg5: memref<16x128xf32, #tpu.memory_space<vmem>>) attributes {dimension_semantics = [#tpu.dimension_semantics<parallel>], iteration_bounds = array<i64: 1>, scalar_prefetch = 0 : i64, scratch_operands = 0 : i64, tpu.core_type = #tpu.core_type<tc>, window_params = [{transform_indices = @transform_0, window_bounds = array<i64: 16, 16>}, {transform_indices = @transform_1, window_bounds = array<i64: 16, 1>}, {pipeline_mode = #tpu.pipeline_mode<synchronous>, transform_indices = @transform_2, window_bounds = array<i64: 1, 16>}, {pipeline_mode = #tpu.pipeline_mode<synchronous>, transform_indices = @transform_3, window_bounds = array<i64: 16, 128>}, {transform_indices = @transform_4, window_bounds = array<i64: 16, 128>}]} {
    %c0 = arith.constant 0 : index
    %c0_0 = arith.constant 0 : index
    %0 = vector.load %arg2[%c0, %c0_0] : memref<16x1xf32, #tpu.memory_space<vmem>>, vector<16x1xf32>
    %c0_1 = arith.constant 0 : index
    %c0_2 = arith.constant 0 : index
    %1 = vector.load %arg3[%c0_1, %c0_2] : memref<1x16xf32, #tpu.memory_space<vmem>>, vector<1x16xf32>
    %2 = vector.broadcast %0 : vector<16x1xf32> to vector<16x16xf32>
    %3 = vector.broadcast %1 : vector<1x16xf32> to vector<16x16xf32>
    %4 = arith.addf %2, %3 : vector<16x16xf32>
    %cst = arith.constant 2.000000e-01 : f32
    %5 = vector.broadcast %cst : f32 to vector<16x16xf32>
    %6 = arith.mulf %5, %4 : vector<16x16xf32>
    %7 = arith.maximumf %4, %6 : vector<16x16xf32>
    %c0_3 = arith.constant 0 : index
    %c0_4 = arith.constant 0 : index
    %8 = vector.load %arg1[%c0_3, %c0_4] : memref<16x16xbf16, #tpu.memory_space<vmem>>, vector<16x16xbf16>
    %9 = arith.extf %8 : vector<16x16xbf16> to vector<16x16xf32>
    %10 = arith.addf %7, %9 : vector<16x16xf32>
    %cst_5 = arith.constant dense<0xFF800000> : vector<16xf32>
    %11 = vector.multi_reduction <maximumf>, %10, %cst_5 [1] : vector<16x16xf32> to vector<16xf32>
    %12 = vector.shape_cast %11 : vector<16xf32> to vector<16x1xf32>
    %13 = vector.broadcast %12 : vector<16x1xf32> to vector<16x16xf32>
    %14 = arith.subf %10, %13 : vector<16x16xf32>
    %15 = math.exp %14 : vector<16x16xf32>
    %cst_6 = arith.constant dense<0.000000e+00> : vector<16xf32>
    %16 = vector.multi_reduction <add>, %15, %cst_6 [1] : vector<16x16xf32> to vector<16xf32>
    %17 = vector.shape_cast %16 : vector<16xf32> to vector<16x1xf32>
    %18 = arith.truncf %15 : vector<16x16xf32> to vector<16x16xbf16>
    %c0_7 = arith.constant 0 : index
    %c0_8 = arith.constant 0 : index
    %19 = vector.load %arg4[%c0_7, %c0_8] : memref<16x128xbf16, #tpu.memory_space<vmem>>, vector<16x128xbf16>
    %cst_9 = arith.constant dense<0.000000e+00> : vector<16x128xf32>
    %20 = tpu.matmul %18, %19, %cst_9 {dimension_numbers = #tpu.dot_dimension_numbers<[1], [0], [0], [1], [0, 0, 1, 1], [], []>} : vector<16x16xbf16>, vector<16x128xbf16>, vector<16x128xf32> -> vector<16x128xf32>
    %21 = tpu.reciprocal %17 {approx = true} : vector<16x1xf32> -> vector<16x1xf32>
    %22 = arith.mulf %17, %21 : vector<16x1xf32>
    %cst_10 = arith.constant 2.000000e+00 : f32
    %23 = vector.broadcast %cst_10 : f32 to vector<16x1xf32>
    %24 = arith.subf %23, %22 : vector<16x1xf32>
    %25 = arith.mulf %21, %24 : vector<16x1xf32>
    %26 = vector.broadcast %25 : vector<16x1xf32> to vector<16x128xf32>
    %27 = arith.mulf %20, %26 : vector<16x128xf32>
    %cst_11 = arith.constant 0.000000e+00 : f32
    %28 = vector.broadcast %cst_11 : f32 to vector<16x128xf32>
    %29 = arith.cmpf ogt, %27, %28 : vector<16x128xf32>
    %30 = math.exp %27 : vector<16x128xf32>
    %cst_12 = arith.constant 1.000000e+00 : f32
    %31 = vector.broadcast %cst_12 : f32 to vector<16x128xf32>
    %32 = arith.subf %30, %31 : vector<16x128xf32>
    %33 = arith.select %29, %27, %32 : vector<16x128xi1>, vector<16x128xf32>
    %c0_13 = arith.constant 0 : index
    %c0_14 = arith.constant 0 : index
    %34 = vector.load %arg5[%c0_13, %c0_14] : memref<16x128xf32, #tpu.memory_space<vmem>>, vector<16x128xf32>
    tpu.vector_store %arg5[%c0_13, %c0_14], %33 {strides = array<i32>} : memref<16x128xf32, #tpu.memory_space<vmem>>, vector<16x128xf32>,
    return
  }
  func.func @transform_0(%arg0: i32) -> (i32, i32) {
    %c0_i32 = arith.constant 0 : i32
    %c0_i32_0 = arith.constant 0 : i32
    return %arg0, %c0_i32 : i32, i32
  }
  func.func @transform_1(%arg0: i32) -> (i32, i32) {
    %c0_i32 = arith.constant 0 : i32
    %c0_i32_0 = arith.constant 0 : i32
    return %arg0, %c0_i32 : i32, i32
  }
  func.func @transform_2(%arg0: i32) -> (i32, i32) {
    %c0_i32 = arith.constant 0 : i32
    %c0_i32_0 = arith.constant 0 : i32
    %c0_i32_1 = arith.constant 0 : i32
    return %c0_i32, %c0_i32_0 : i32, i32
  }
  func.func @transform_3(%arg0: i32) -> (i32, i32) {
    %c0_i32 = arith.constant 0 : i32
    %c0_i32_0 = arith.constant 0 : i32
    %c0_i32_1 = arith.constant 0 : i32
    return %c0_i32, %c0_i32_0 : i32, i32
  }
  func.func @transform_4(%arg0: i32) -> (i32, i32) {
    %c0_i32 = arith.constant 0 : i32
    %c0_i32_0 = arith.constant 0 : i32
    return %arg0, %c0_i32 : i32, i32
  }
}

</mosaic_0001>

<bundles_post_ra>
// kernel: tpu_custom_call.1
= control target key start
LH: loop header
LB: loop body
LE: loop exit
PB: predicated region body
PF: predicated region fallthrough
CT: control target
= control target key end

     0   :  { %v219_v1 = vmov 0   ;;  %s273_s0 = inlined_call_operand.vmem [shape: bf16[16,16], index: 0, kind: input, shape index: {}]   ;;  %s274_s1 = inlined_call_operand.vmem [shape: f32[16,1], index: 1, kind: input, shape index: {}]   ;;  %s275_s2 = inlined_call_operand.vmem [shape: f32[1,16], index: 2, kind: input, shape index: {}]   ;;  %s276_s3 = inlined_call_operand.vmem [shape: bf16[16,128], index: 3, kind: input, shape index: {}]   ;;  %s277_s4 = inlined_call_operand.hbm [shape: f32[16,128], index: 4, kind: output, shape index: {}]  }
   0x1   :  { %v19_v0 = vld [vmem:[%s274_s1] sm:$0xff]  ;;  %183 = vset.pattern.permute.xlu0 %v219_v1 }
   0x2   :  { %24 = vperm.xlu0 %183, %v19_v0  }
   0x3   :  { %9 = vsyncpa [#allocation3], 0  ;;  %v20_v2 = vld [vmem:[%s274_s1 + $0x8] sm:$0xff]  ;;  %v160_v3 = vld [vmem:[%s275_s2] ss:$0 sm:$0xff]  ;;  %vm50_vm0 = vcmask 130048  }
   0x4   :  { %v166_v5 = vld [vmem:[%s273_s0] sm:$0xff]   ;;  %v220_v20 = vmov 0.0   ;;  %vm221_vm1 = vmmov 0   ;;  %s222_s2 = smov [#allocation2]  }
   0x5   :  { %v167_v8 = vunpack.c.l.bf16 %v166_v5  ;;  %v168_v14 = vunpack.c.h.bf16 %v166_v5  ;;  %v184_v19 = vld [vmem:[%s276_s3] sm:$0xff]   ;;  %171 = vmatprep.subr.bf16.mxu0 %v220_v20  ;;  %173 = vmatprep.mubr.msk.bf16.mxu0 %vm221_vm1, %v220_v20  ;;  %s149_s3 = sshll.u32 %s222_s2, 4  ;;  %s150_s3 = int_to_ptr.vmem [resolvable:$true] %s149_s3 }
   0x6   :  { %29 = vperm.xlu0 %183, %v20_v2   ;;  %172 = vmatpush3.bf16.msra.mxu0 %v184_v19  ;;  %s197_s23 = scalar_lea.vmem %s150_s3, 256  ;;  %p202_p1 = scmp.lt.s32.totalorder %s150_s3, %s150_s3 }
   0x7   :  { %p198_p0 = scmp.ne.s32.totalorder %s150_s3, %s197_s23  ;;  %p203_p2 = scmp.lt.s32.totalorder %s197_s23, %s197_s23 }
   0x9   :  { %p204_p3 = por %p203_p2, %p202_p1 }
   0xb   :  { %p205_p4 = pnand %p204_p3, %p198_p0 }
  0x7d   :  { %v25_v4 = vpop.permute.xlu0 %24 }
  0x7e   :  { %v38_v6 = vadd.f32 %v160_v3, %v25_v4 }
  0x80   :  { %v40_v7 = vmul.f32 0.2, %v38_v6 }
  0x81   :  { %v30_v9 = vpop.permute.xlu0 %29 }
  0x82   :  { %v42_v10 = vmax.f32 %v38_v6, %v40_v7  ;;  %v39_v11 = vadd.f32 %v160_v3, %v30_v9 }
  0x84   :  { %v41_v12 = vmul.f32 0.2, %v39_v11  ;;  %v48_v13 = vadd.f32 %v167_v8, %v42_v10 }
  0x86   :  { %v43_v15 = vmax.f32 %v39_v11, %v41_v12  ;;  %v51_v16 = vsel %vm50_vm0, %v48_v13, -inf }
  0x87   :  { %52 = vmax.xlane.f32.xlu1 %v51_v16 }
  0x88   :  { %v49_v17 = vadd.f32 %v168_v14, %v43_v15 }
  0x8a   :  { %v54_v18 = vsel %vm50_vm0, %v49_v17, -inf }
  0x8b   :  { %55 = vmax.xlane.f32.xlu1 %v54_v18 }
 0x110   :  { %v53_v21 = vpop.xlane.xlu1 %52 }
 0x111   :  { %v57_v22 = vsub.f32 %v48_v13, %v53_v21 }
 0x113   :  { %v59_v23 = vmul.f32 1.442695, %v57_v22 }
 0x114   :  { %v56_v24 = vpop.xlane.xlu1 %55 }
 0x115   :  { %185 = vpow2.f32 %v59_v23  ;;  %v58_v25 = vsub.f32 %v49_v17, %v56_v24 }
 0x117   :  { %v61_v26 = vmul.f32 1.442695, %v58_v25 }
 0x119   :  { %187 = vpow2.f32 %v61_v26 }
 0x122   :  { %v186_v27 = vpop.eup %185 }
 0x123   :  { %v63_v28 = vsel %vm50_vm0, %v186_v27, 0.0 }
 0x124   :  { %64 = vadd.xlane.f32.xlu0 %v63_v28 }
 0x126   :  { %v188_v29 = vpop.eup %187 }
 0x127   :  { %v66_v30 = vsel %vm50_vm0, %v188_v29, 0.0  ;;  %v69_v31 = vpack.c.bf16 %v188_v29, %v186_v27 }
 0x128   :  { %67 = vadd.xlane.f32.xlu1 %v66_v30 }
 0x129   :  { %174 = vmatmul.mubr.msk.bf16.vlgmr.msra.gmra.mxu0 %vm50_vm0, %v69_v31 }
 0x1ad   :  { %v65_v32 = vpop.xlane.xlu0 %64 }
 0x1ae   :  { %189 = vrcp.f32 %v65_v32 }
 0x1b1   :  { %v68_v33 = vpop.xlane.xlu1 %67 }
 0x1b2   :  { %191 = vrcp.f32 %v68_v33 }
 0x1bb   :  { %v190_v34 = vpop.eup %189 }
 0x1bc   :  { %v124_v35 = vmul.f32 %v190_v34, %v65_v32 }
 0x1be   :  { %v126_v37 = vsub.f32 2.0, %v124_v35 }
 0x1bf   :  { %v192_v36 = vpop.eup %191 }
 0x1c0   :  { %v125_v38 = vmul.f32 %v192_v36, %v68_v33  ;;  %v128_v40 = vmul.f32 %v190_v34, %v126_v37 }
 0x1c2   :  { %v127_v39 = vsub.f32 2.0, %v125_v38 }
 0x1c4   :  { %v129_v45 = vmul.f32 %v192_v36, %v127_v39 }
 0x1e9   :  { %v115_v41 = vpop.f32.mrf.mxu0 }
 0x1ea   :  { %v130_v42 = vmul.f32 %v128_v40, %v115_v41 }
 0x1eb   :  { %v175_v43 = vpop.f32.mrf.mxu0 }
 0x1ec   :  { %v134_v44 = vmul.f32 1.442695, %v130_v42  ;;  %vm132_vm2 = vcmp.gt.f32.partialorder %v130_v42, 0.0 }
 0x1ed   :  { %v118_v46 = vpop.f32.mrf.mxu0 }
 0x1ee   :  { %193 = vpow2.f32 %v134_v44  ;;  %v131_v47 = vmul.f32 %v129_v45, %v118_v46 }
 0x1ef   :  { %v176_v48 = vpop.f32.mrf.mxu0 }
 0x1f0   :  { %v136_v49 = vmul.f32 1.442695, %v131_v47  ;;  %vm133_vm3 = vcmp.gt.f32.partialorder %v131_v47, 0.0 }
 0x1f2   :  { %195 = vpow2.f32 %v136_v49 }
 0x1fb   :  { %v194_v50 = vpop.eup %193 }
 0x1fc   :  { %v163_v51 = vadd.f32 -1.0, %v194_v50 }
 0x1fe   :  { %v140_v52 = vsel %vm132_vm2, %v130_v42, %v163_v51 }
 0x1ff   :  { %v196_v53 = vpop.eup %195  ;;  %142 = vst [vmem:[#allocation2] sm:$0xff] %v140_v52 }
 0x200   :  { %v164_v54 = vadd.f32 -1.0, %v196_v53 }
 0x202   :  { %v141_v55 = vsel %vm133_vm3, %v131_v47, %v164_v54 }
 0x203   :  { %143 = vst [vmem:[#allocation2 + $0x8] sm:$0xff] %v141_v55 }
 0x204   :  { %208 = shalt.err (!%p205_p4)
}
 0x205   :  { %s223_s24 = smov 128   ;;  %s224_s25 = smov 8  }
 0x206   :  { %155 = dma.vmem_to_hbm [thread:$0]  %s150_s3, 256, %s277_s4, [#allocation3], %s223_s24, %s223_s24, %s224_s25  }
 0x207   :  { %217 = dma.done.wait [#allocation3], 256  }
 0x208   :  { %218 = vsyncadd [#allocation3], 4294967040 }
 0x209   :  { %159 = vsyncpa [#allocation3], 1 }

// kernel: tpu_custom_call.1
= control target key start
LH: loop header
LB: loop body
LE: loop exit
PB: predicated region body
PF: predicated region fallthrough
CT: control target
= control target key end

     0   :  { %v219_v1 = vmov 0   ;;  %s273_s0 = inlined_call_operand.vmem [shape: bf16[16,16], index: 0, kind: input, shape index: {}]   ;;  %s274_s1 = inlined_call_operand.vmem [shape: f32[16,1], index: 1, kind: input, shape index: {}]   ;;  %s275_s2 = inlined_call_operand.vmem [shape: f32[1,16], index: 2, kind: input, shape index: {}]   ;;  %s276_s3 = inlined_call_operand.vmem [shape: bf16[16,128], index: 3, kind: input, shape index: {}]   ;;  %s277_s4 = inlined_call_operand.hbm [shape: f32[16,128], index: 4, kind: output, shape index: {}]  }
   0x1   :  { %v19_v0 = vld [vmem:[%s274_s1] sm:$0xff]  ;;  %183 = vset.pattern.permute.xlu0 %v219_v1 }
   0x2   :  { %24 = vperm.xlu0 %183, %v19_v0  }
   0x3   :  { %9 = vsyncpa [#allocation3], 0  ;;  %v20_v2 = vld [vmem:[%s274_s1 + $0x8] sm:$0xff]  ;;  %v160_v3 = vld [vmem:[%s275_s2] ss:$0 sm:$0xff]  ;;  %vm50_vm0 = vcmask 130048  }
   0x4   :  { %v166_v5 = vld [vmem:[%s273_s0] sm:$0xff]   ;;  %v220_v20 = vmov 0.0   ;;  %vm221_vm1 = vmmov 0   ;;  %s222_s2 = smov [#allocation2]  }
   0x5   :  { %v167_v8 = vunpack.c.l.bf16 %v166_v5  ;;  %v168_v14 = vunpack.c.h.bf16 %v166_v5  ;;  %v184_v19 = vld [vmem:[%s276_s3] sm:$0xff]   ;;  %171 = vmatprep.subr.bf16.mxu0 %v220_v20  ;;  %173 = vmatprep.mubr.msk.bf16.mxu0 %vm221_vm1, %v220_v20  ;;  %s149_s3 = sshll.u32 %s222_s2, 4  ;;  %s150_s3 = int_to_ptr.vmem [resolvable:$true] %s149_s3 }
   0x6   :  { %29 = vperm.xlu0 %183, %v20_v2   ;;  %172 = vmatpush3.bf16.msra.mxu0 %v184_v19  ;;  %s197_s23 = scalar_lea.vmem %s150_s3, 256  ;;  %p202_p1 = scmp.lt.s32.totalorder %s150_s3, %s150_s3 }
   0x7   :  { %p198_p0 = scmp.ne.s32.totalorder %s150_s3, %s197_s23  ;;  %p203_p2 = scmp.lt.s32.totalorder %s197_s23, %s197_s23 }
   0x9   :  { %p204_p3 = por %p203_p2, %p202_p1 }
   0xb   :  { %p205_p4 = pnand %p204_p3, %p198_p0 }
  0x7d   :  { %v25_v4 = vpop.permute.xlu0 %24 }
  0x7e   :  { %v38_v6 = vadd.f32 %v160_v3, %v25_v4 }
  0x80   :  { %v40_v7 = vmul.f32 0.2, %v38_v6 }
  0x81   :  { %v30_v9 = vpop.permute.xlu0 %29 }
  0x82   :  { %v42_v10 = vmax.f32 %v38_v6, %v40_v7  ;;  %v39_v11 = vadd.f32 %v160_v3, %v30_v9 }
  0x84   :  { %v41_v12 = vmul.f32 0.2, %v39_v11  ;;  %v48_v13 = vadd.f32 %v167_v8, %v42_v10 }
  0x86   :  { %v43_v15 = vmax.f32 %v39_v11, %v41_v12  ;;  %v51_v16 = vsel %vm50_vm0, %v48_v13, -inf }
  0x87   :  { %52 = vmax.xlane.f32.xlu1 %v51_v16 }
  0x88   :  { %v49_v17 = vadd.f32 %v168_v14, %v43_v15 }
  0x8a   :  { %v54_v18 = vsel %vm50_vm0, %v49_v17, -inf }
  0x8b   :  { %55 = vmax.xlane.f32.xlu1 %v54_v18 }
 0x110   :  { %v53_v21 = vpop.xlane.xlu1 %52 }
 0x111   :  { %v57_v22 = vsub.f32 %v48_v13, %v53_v21 }
 0x113   :  { %v59_v23 = vmul.f32 1.442695, %v57_v22 }
 0x114   :  { %v56_v24 = vpop.xlane.xlu1 %55 }
 0x115   :  { %185 = vpow2.f32 %v59_v23  ;;  %v58_v25 = vsub.f32 %v49_v17, %v56_v24 }
 0x117   :  { %v61_v26 = vmul.f32 1.442695, %v58_v25 }
 0x119   :  { %187 = vpow2.f32 %v61_v26 }
 0x122   :  { %v186_v27 = vpop.eup %185 }
 0x123   :  { %v63_v28 = vsel %vm50_vm0, %v186_v27, 0.0 }
 0x124   :  { %64 = vadd.xlane.f32.xlu0 %v63_v28 }
 0x126   :  { %v188_v29 = vpop.eup %187 }
 0x127   :  { %v66_v30 = vsel %vm50_vm0, %v188_v29, 0.0  ;;  %v69_v31 = vpack.c.bf16 %v188_v29, %v186_v27 }
 0x128   :  { %67 = vadd.xlane.f32.xlu1 %v66_v30 }
 0x129   :  { %174 = vmatmul.mubr.msk.bf16.vlgmr.msra.gmra.mxu0 %vm50_vm0, %v69_v31 }
 0x1ad   :  { %v65_v32 = vpop.xlane.xlu0 %64 }
 0x1ae   :  { %189 = vrcp.f32 %v65_v32 }
 0x1b1   :  { %v68_v33 = vpop.xlane.xlu1 %67 }
 0x1b2   :  { %191 = vrcp.f32 %v68_v33 }
 0x1bb   :  { %v190_v34 = vpop.eup %189 }
 0x1bc   :  { %v124_v35 = vmul.f32 %v190_v34, %v65_v32 }
 0x1be   :  { %v126_v37 = vsub.f32 2.0, %v124_v35 }
 0x1bf   :  { %v192_v36 = vpop.eup %191 }
 0x1c0   :  { %v125_v38 = vmul.f32 %v192_v36, %v68_v33  ;;  %v128_v40 = vmul.f32 %v190_v34, %v126_v37 }
 0x1c2   :  { %v127_v39 = vsub.f32 2.0, %v125_v38 }
 0x1c4   :  { %v129_v45 = vmul.f32 %v192_v36, %v127_v39 }
 0x1e9   :  { %v115_v41 = vpop.f32.mrf.mxu0 }
 0x1ea   :  { %v130_v42 = vmul.f32 %v128_v40, %v115_v41 }
 0x1eb   :  { %v175_v43 = vpop.f32.mrf.mxu0 }
 0x1ec   :  { %v134_v44 = vmul.f32 1.442695, %v130_v42  ;;  %vm132_vm2 = vcmp.gt.f32.partialorder %v130_v42, 0.0 }
 0x1ed   :  { %v118_v46 = vpop.f32.mrf.mxu0 }
 0x1ee   :  { %193 = vpow2.f32 %v134_v44  ;;  %v131_v47 = vmul.f32 %v129_v45, %v118_v46 }
 0x1ef   :  { %v176_v48 = vpop.f32.mrf.mxu0 }
 0x1f0   :  { %v136_v49 = vmul.f32 1.442695, %v131_v47  ;;  %vm133_vm3 = vcmp.gt.f32.partialorder %v131_v47, 0.0 }
 0x1f2   :  { %195 = vpow2.f32 %v136_v49 }
 0x1fb   :  { %v194_v50 = vpop.eup %193 }
 0x1fc   :  { %v163_v51 = vadd.f32 -1.0, %v194_v50 }
 0x1fe   :  { %v140_v52 = vsel %vm132_vm2, %v130_v42, %v163_v51 }
 0x1ff   :  { %v196_v53 = vpop.eup %195  ;;  %142 = vst [vmem:[#allocation2] sm:$0xff] %v140_v52 }
 0x200   :  { %v164_v54 = vadd.f32 -1.0, %v196_v53 }
 0x202   :  { %v141_v55 = vsel %vm133_vm3, %v131_v47, %v164_v54 }
 0x203   :  { %143 = vst [vmem:[#allocation2 + $0x8] sm:$0xff] %v141_v55 }
 0x204   :  { %208 = shalt.err (!%p205_p4)
}
 0x205   :  { %s223_s24 = smov 128   ;;  %s224_s25 = smov 8  }
 0x206   :  { %155 = dma.vmem_to_hbm [thread:$0]  %s150_s3, 256, %s277_s4, [#allocation3], %s223_s24, %s223_s24, %s224_s25  }
 0x207   :  { %217 = dma.done.wait [#allocation3], 256  }
 0x208   :  { %218 = vsyncadd [#allocation3], 4294967040 }
 0x209   :  { %159 = vsyncpa [#allocation3], 1 }

</bundles_post_ra>
